<compile_context>
chip_gen: v6e
topology: v6e:2x2x1
jax: 0.10.0
libtpu: 0.0.40
codegen_flags: <defaults>
</compile_context>

<pallas_src>
import functools

import jax
import jax.numpy as jnp
from jax import lax
from jax.experimental import pallas as pl
from jax.experimental.pallas import tpu as pltpu

HIDDEN = 64          # per the PyTorch module
WIDTH = 2 * HIDDEN   # packed (actor|critic) lane width = 128


def _round_up(n, m):
    return ((n + m - 1) // m) * m


def _choose_tiling(batch, tile_b_req):
    """Pick (tile_b, n_steps, padded_batch) minimizing padding waste and
    keeping >=2 grid steps for v7x megacore when the batch is big enough."""
    tile_b_req = max(8, _round_up(tile_b_req, 8))
    n_steps = pl.cdiv(batch, tile_b_req)
    if n_steps == 1 and batch >= 256:
        n_steps = 2                                   # both v7x TensorCores busy
    tile_b = _round_up(pl.cdiv(batch, n_steps), 8)
    n_steps = pl.cdiv(batch, tile_b)                  # re-derive after rounding
    return tile_b, n_steps, tile_b * n_steps


def ppo_kernel(x_ref, w1_ref, w2_ref, w3_ref, b_ref, out_ref, xpad_ref, *,
               state_size, action_size, compute_dtype):
    # ---- build the 128-lane state slab in VMEM from the narrow (tile_b, S) block ----
    # Zero pad lanes every step (cheap VMEM store; safe under megacore splitting
    # of the parallel batch axis), then masked-store the S real columns.
    xpad_ref[...] = jnp.zeros_like(xpad_ref)
    xpad_ref[:, :state_size] = x_ref[...]
    x_f32 = xpad_ref[...]                             # (tile_b, 128) f32

    def cast(t):
        return t if compute_dtype == jnp.float32 else t.astype(compute_dtype)

    # ---- fused actor+critic MLP: three lane-dense (tile_b,128)@(128,128) matmuls ----
    h = jnp.dot(cast(x_f32), cast(w1_ref[...]),
                preferred_element_type=jnp.float32) + b_ref[0:1, :]
    h = jnp.maximum(h, 0.0)
    h = jnp.dot(cast(h), cast(w2_ref[...]),
                preferred_element_type=jnp.float32) + b_ref[1:2, :]
    h = jnp.maximum(h, 0.0)
    out3 = jnp.dot(cast(h), cast(w3_ref[...]),
                   preferred_element_type=jnp.float32) + b_ref[2:3, :]
    # out3: lanes 0..A-1 = actor logits, lane A = critic value, rest exactly 0.

    # ---- masked softmax over logit lanes, fully 128-lane-parallel ----
    lane = lax.broadcasted_iota(jnp.int32, out3.shape, 1)
    is_logit = lane < action_size
    is_value = lane == action_size

    # mask = state[:, :action_size] lives in lanes 0..A-1 of the padded state.
    mask_vals = jnp.where(is_logit, x_f32, 0.0)
    logits = out3 - 1.0e10 * mask_vals
    masked_logits = jnp.where(is_logit, logits, -jnp.inf)

    m = jnp.max(masked_logits, axis=-1, keepdims=True)
    e = jnp.exp(masked_logits - m)                    # padding lanes -> exp(-inf) = 0
    denom = jnp.sum(e, axis=-1, keepdims=True)
    # approx=True (EUP vrcp) is a free-slot option; kept exact for 2e-5 tolerance.
    policy = e * pl.reciprocal(denom, approx=False)

    # policy in logit lanes, critic value in lane A, zeros elsewhere (dense vst).
    out_ref[...] = jnp.where(is_value, out3, policy)


def pack_params(p, state_size, action_size, hidden=HIDDEN,
                weight_dtype=jnp.float32):
    """One-time packing of the 12 Linear tensors into 3 (128,128) weight slabs
    and one (8,128) f32 bias slab (actor | critic fused along lanes).
    weight_dtype=bf16 pre-casts the slabs once (v6e/v7x, ~1e-3 accuracy)."""
    assert hidden == HIDDEN, "packing assumes hidden width 64 -> 128-lane slabs"
    assert state_size <= WIDTH and action_size + 1 <= WIDTH
    w1 = jnp.zeros((WIDTH, WIDTH), jnp.float32)
    w1 = w1.at[:state_size, :hidden].set(p["wa1"]).at[:state_size, hidden:].set(p["wc1"])
    w2 = jnp.zeros((WIDTH, WIDTH), jnp.float32)
    w2 = w2.at[:hidden, :hidden].set(p["wa2"]).at[hidden:, hidden:].set(p["wc2"])
    w3 = jnp.zeros((WIDTH, WIDTH), jnp.float32)
    w3 = w3.at[:hidden, :action_size].set(p["wa3"])
    w3 = w3.at[hidden:, action_size:action_size + 1].set(p["wc3"])
    b = jnp.zeros((8, WIDTH), jnp.float32)
    b = b.at[0, :hidden].set(p["ba1"][0]).at[0, hidden:].set(p["bc1"][0])
    b = b.at[1, :hidden].set(p["ba2"][0]).at[1, hidden:].set(p["bc2"][0])
    b = b.at[2, :action_size].set(p["ba3"][0]).at[2, action_size].set(p["bc3"][0, 0])
    return {"w1": w1.astype(weight_dtype), "w2": w2.astype(weight_dtype),
            "w3": w3.astype(weight_dtype), "b": b}


def ppo_forward(state, packed, *, tile_b=2048, compute_dtype=jnp.float32):
    """state: (B, S). Returns (policy (B, S-1), value (B, 1))."""
    B, S = state.shape
    A = S - 1
    assert S <= WIDTH

    tile_b, n_steps, B_pad = _choose_tiling(B, tile_b)

    # Narrow state input: only pad the batch dim to tile alignment (no 128-lane slab).
    x = state.astype(jnp.float32)
    if B_pad != B:
        x = jnp.pad(x, ((0, B_pad - B), (0, 0)))

    kernel = functools.partial(ppo_kernel, state_size=S, action_size=A,
                               compute_dtype=compute_dtype)

    out = pl.pallas_call(
        kernel,
        out_shape=jax.ShapeDtypeStruct((B_pad, WIDTH), jnp.float32),
        grid=(n_steps,),
        in_specs=[
            pl.BlockSpec((tile_b, S), lambda i: (i, 0)),       # narrow state blocks
            pl.BlockSpec((WIDTH, WIDTH), lambda i: (0, 0)),    # W1 (resident)
            pl.BlockSpec((WIDTH, WIDTH), lambda i: (0, 0)),    # W2 (resident)
            pl.BlockSpec((WIDTH, WIDTH), lambda i: (0, 0)),    # W3 (resident)
            pl.BlockSpec((8, WIDTH), lambda i: (0, 0)),        # bias slab (resident)
        ],
        out_specs=pl.BlockSpec((tile_b, WIDTH), lambda i: (i, 0)),
        scratch_shapes=[pltpu.VMEM((tile_b, WIDTH), jnp.float32)],  # 128-lane x slab
        compiler_params=pltpu.CompilerParams(
            dimension_semantics=("parallel",)),                # megacore on v7x
    )(x, packed["w1"], packed["w2"], packed["w3"], packed["b"])

    policy = out[:B, :A]
    value = out[:B, A:A + 1]
    return policy, value


def init_params(key, state_size, action_size, hidden=HIDDEN):
    """Deterministic init mimicking PyTorch's U(-1/sqrt(fan_in), 1/sqrt(fan_in))."""
    def linear(key, fan_in, fan_out):
        kw, kb = jax.random.split(key)
        bound = 1.0 / jnp.sqrt(fan_in)
        w = jax.random.uniform(kw, (fan_in, fan_out), jnp.float32, -bound, bound)
        b = jax.random.uniform(kb, (1, fan_out), jnp.float32, -bound, bound)
        return w, b

    keys = jax.random.split(key, 6)
    wa1, ba1 = linear(keys[0], state_size, hidden)
    wa2, ba2 = linear(keys[1], hidden, hidden)
    wa3, ba3 = linear(keys[2], hidden, action_size)
    wc1, bc1 = linear(keys[3], state_size, hidden)
    wc2, bc2 = linear(keys[4], hidden, hidden)
    wc3, bc3 = linear(keys[5], hidden, 1)
    return dict(wa1=wa1, ba1=ba1, wa2=wa2, ba2=ba2, wa3=wa3, ba3=ba3,
                wc1=wc1, bc1=bc1, wc2=wc2, bc2=bc2, wc3=wc3, bc3=bc3)


def ppo_reference(state, p):
    """Plain-JAX reference reproducing the PyTorch forward."""
    relu = lambda x: jnp.maximum(x, 0.0)
    h = relu(state @ p["wa1"] + p["ba1"])
    h = relu(h @ p["wa2"] + p["ba2"])
    logits = h @ p["wa3"] + p["ba3"]
    logits = logits - 1.0e10 * state[:, :-1]
    policy = jax.nn.softmax(logits, axis=-1)
    c = relu(state @ p["wc1"] + p["bc1"])
    c = relu(c @ p["wc2"] + p["bc2"])
    value = c @ p["wc3"] + p["bc3"]
    return policy, value


def _make_state(key, batch, state_size):
    k_state, k_mask = jax.random.split(key)
    action_size = state_size - 1
    mask_cols = (jax.random.uniform(k_mask, (batch, action_size)) < 0.3).astype(jnp.float32)
    extra_col = jax.random.normal(k_state, (batch, 1), jnp.float32)
    return jnp.concatenate([mask_cols, extra_col], axis=1)


if __name__ == "__main__":
    key = jax.random.PRNGKey(0)
    k_state, k_params, k_big = jax.random.split(key, 3)

    state_size = 9            # last column is extra state; mask = state[:, :-1]
    action_size = state_size - 1

    params = init_params(k_params, state_size, action_size)
    packed = pack_params(params, state_size, action_size)

    # --- small batch (grid = 1, tile_b = 8) ---
    batch = 8
    state = _make_state(k_state, batch, state_size)
    policy, value = ppo_forward(state, packed)
    jax.block_until_ready((policy, value))
    ref_policy, ref_value = ppo_reference(state, params)
    assert policy.shape == (batch, action_size) and value.shape == (batch, 1)
    assert jnp.allclose(policy, ref_policy, atol=2e-5, rtol=2e-5)
    assert jnp.allclose(value, ref_value, atol=2e-5, rtol=2e-5)

    # --- larger batch: exercises >=2 grid steps (megacore path) + batch padding ---
    big_batch = 300
    big_state = _make_state(k_big, big_batch, state_size)
    big_policy, big_value = ppo_forward(big_state, packed)
    jax.block_until_ready((big_policy, big_value))
    ref_bp, ref_bv = ppo_reference(big_state, params)
    assert big_policy.shape == (big_batch, action_size) and big_value.shape == (big_batch, 1)
    assert jnp.allclose(big_policy, ref_bp, atol=2e-5, rtol=2e-5)
    assert jnp.allclose(big_value, ref_bv, atol=2e-5, rtol=2e-5)

    print("KERNEL_OK")
</pallas_src>

<mosaic_0001>
module attributes {stable_mosaic.version = 11 : i64} {
  func.func @ppo_kernel(%arg0: i32, %arg1: memref<8x9xf32, #tpu.memory_space<vmem>>, %arg2: memref<128x128xf32, #tpu.memory_space<vmem>>, %arg3: memref<128x128xf32, #tpu.memory_space<vmem>>, %arg4: memref<128x128xf32, #tpu.memory_space<vmem>>, %arg5: memref<8x128xf32, #tpu.memory_space<vmem>>, %arg6: memref<8x128xf32, #tpu.memory_space<vmem>>, %arg7: memref<8x128xf32, #tpu.memory_space<vmem>>) attributes {dimension_semantics = [#tpu.dimension_semantics<parallel>], iteration_bounds = array<i64: 1>, scalar_prefetch = 0 : i64, scratch_operands = 1 : i64, tpu.core_type = #tpu.core_type<tc>, window_params = [{transform_indices = @transform_0, window_bounds = array<i64: 8, 9>}, {pipeline_mode = #tpu.pipeline_mode<synchronous>, transform_indices = @transform_1, window_bounds = array<i64: 128, 128>}, {pipeline_mode = #tpu.pipeline_mode<synchronous>, transform_indices = @transform_2, window_bounds = array<i64: 128, 128>}, {pipeline_mode = #tpu.pipeline_mode<synchronous>, transform_indices = @transform_3, window_bounds = array<i64: 128, 128>}, {pipeline_mode = #tpu.pipeline_mode<synchronous>, transform_indices = @transform_4, window_bounds = array<i64: 8, 128>}, {transform_indices = @transform_5, window_bounds = array<i64: 8, 128>}]} {
    %cst = arith.constant 0.000000e+00 : f32
    %0 = vector.broadcast %cst : f32 to vector<8x128xf32>
    %c0 = arith.constant 0 : index
    %c0_0 = arith.constant 0 : index
    %1 = vector.load %arg7[%c0, %c0_0] : memref<8x128xf32, #tpu.memory_space<vmem>>, vector<8x128xf32>
    tpu.vector_store %arg7[%c0, %c0_0], %0 {strides = array<i32>} : memref<8x128xf32, #tpu.memory_space<vmem>>, vector<8x128xf32>,
    %c0_1 = arith.constant 0 : index
    %c0_2 = arith.constant 0 : index
    %2 = vector.load %arg1[%c0_1, %c0_2] : memref<8x9xf32, #tpu.memory_space<vmem>>, vector<8x9xf32>
    %c0_3 = arith.constant 0 : index
    %c0_4 = arith.constant 0 : index
    %3 = vector.load %arg7[%c0_3, %c0_4] : memref<8x128xf32, #tpu.memory_space<vmem>>, vector<8x9xf32>
    tpu.vector_store %arg7[%c0_3, %c0_4], %2 {strides = array<i32>} : memref<8x128xf32, #tpu.memory_space<vmem>>, vector<8x9xf32>,
    %c0_5 = arith.constant 0 : index
    %c0_6 = arith.constant 0 : index
    %4 = vector.load %arg7[%c0_5, %c0_6] : memref<8x128xf32, #tpu.memory_space<vmem>>, vector<8x128xf32>
    %c0_7 = arith.constant 0 : index
    %c0_8 = arith.constant 0 : index
    %5 = vector.load %arg2[%c0_7, %c0_8] : memref<128x128xf32, #tpu.memory_space<vmem>>, vector<128x128xf32>
    %cst_9 = arith.constant dense<0.000000e+00> : vector<8x128xf32>
    %6 = tpu.matmul %4, %5, %cst_9 {dimension_numbers = #tpu.dot_dimension_numbers<[1], [0], [0], [1], [0, 0, 1, 1], [], []>} : vector<8x128xf32>, vector<128x128xf32>, vector<8x128xf32> -> vector<8x128xf32>
    %c0_10 = arith.constant 0 : index
    %c0_11 = arith.constant 0 : index
    %7 = vector.load %arg5[%c0_10, %c0_11] : memref<8x128xf32, #tpu.memory_space<vmem>>, vector<1x128xf32>
    %8 = vector.broadcast %7 : vector<1x128xf32> to vector<8x128xf32>
    %9 = arith.addf %6, %8 : vector<8x128xf32>
    %cst_12 = arith.constant 0.000000e+00 : f32
    %10 = vector.broadcast %cst_12 : f32 to vector<8x128xf32>
    %11 = arith.maximumf %9, %10 : vector<8x128xf32>
    %c0_13 = arith.constant 0 : index
    %c0_14 = arith.constant 0 : index
    %12 = vector.load %arg3[%c0_13, %c0_14] : memref<128x128xf32, #tpu.memory_space<vmem>>, vector<128x128xf32>
    %cst_15 = arith.constant dense<0.000000e+00> : vector<8x128xf32>
    %13 = tpu.matmul %11, %12, %cst_15 {dimension_numbers = #tpu.dot_dimension_numbers<[1], [0], [0], [1], [0, 0, 1, 1], [], []>} : vector<8x128xf32>, vector<128x128xf32>, vector<8x128xf32> -> vector<8x128xf32>
    %c1 = arith.constant 1 : index
    %c0_16 = arith.constant 0 : index
    %14 = vector.load %arg5[%c1, %c0_16] : memref<8x128xf32, #tpu.memory_space<vmem>>, vector<1x128xf32>
    %15 = vector.broadcast %14 : vector<1x128xf32> to vector<8x128xf32>
    %16 = arith.addf %13, %15 : vector<8x128xf32>
    %cst_17 = arith.constant 0.000000e+00 : f32
    %17 = vector.broadcast %cst_17 : f32 to vector<8x128xf32>
    %18 = arith.maximumf %16, %17 : vector<8x128xf32>
    %c0_18 = arith.constant 0 : index
    %c0_19 = arith.constant 0 : index
    %19 = vector.load %arg4[%c0_18, %c0_19] : memref<128x128xf32, #tpu.memory_space<vmem>>, vector<128x128xf32>
    %cst_20 = arith.constant dense<0.000000e+00> : vector<8x128xf32>
    %20 = tpu.matmul %18, %19, %cst_20 {dimension_numbers = #tpu.dot_dimension_numbers<[1], [0], [0], [1], [0, 0, 1, 1], [], []>} : vector<8x128xf32>, vector<128x128xf32>, vector<8x128xf32> -> vector<8x128xf32>
    %c2 = arith.constant 2 : index
    %c0_21 = arith.constant 0 : index
    %21 = vector.load %arg5[%c2, %c0_21] : memref<8x128xf32, #tpu.memory_space<vmem>>, vector<1x128xf32>
    %22 = vector.broadcast %21 : vector<1x128xf32> to vector<8x128xf32>
    %23 = arith.addf %20, %22 : vector<8x128xf32>
    %24 = tpu.iota {dimensions = array<i32: 1>} : vector<8x128xi32>
    %c8_i32 = arith.constant 8 : i32
    %25 = vector.broadcast %c8_i32 : i32 to vector<8x128xi32>
    %26 = arith.cmpi slt, %24, %25 : vector<8x128xi32>
    %c8_i32_22 = arith.constant 8 : i32
    %27 = vector.broadcast %c8_i32_22 : i32 to vector<8x128xi32>
    %28 = arith.cmpi eq, %24, %27 : vector<8x128xi32>
    %cst_23 = arith.constant 0.000000e+00 : f32
    %29 = vector.broadcast %cst_23 : f32 to vector<8x128xf32>
    %30 = arith.select %26, %4, %29 : vector<8x128xi1>, vector<8x128xf32>
    %cst_24 = arith.constant 1.000000e+10 : f32
    %31 = vector.broadcast %cst_24 : f32 to vector<8x128xf32>
    %32 = arith.mulf %31, %30 : vector<8x128xf32>
    %33 = arith.subf %23, %32 : vector<8x128xf32>
    %cst_25 = arith.constant 0xFF800000 : f32
    %34 = vector.broadcast %cst_25 : f32 to vector<8x128xf32>
    %35 = arith.select %26, %33, %34 : vector<8x128xi1>, vector<8x128xf32>
    %cst_26 = arith.constant dense<0xFF800000> : vector<8xf32>
    %36 = vector.multi_reduction <maximumf>, %35, %cst_26 [1] : vector<8x128xf32> to vector<8xf32>
    %37 = vector.shape_cast %36 : vector<8xf32> to vector<8x1xf32>
    %38 = vector.broadcast %37 : vector<8x1xf32> to vector<8x128xf32>
    %39 = arith.subf %35, %38 : vector<8x128xf32>
    %40 = math.exp %39 : vector<8x128xf32>
    %cst_27 = arith.constant dense<0.000000e+00> : vector<8xf32>
    %41 = vector.multi_reduction <add>, %40, %cst_27 [1] : vector<8x128xf32> to vector<8xf32>
    %42 = vector.shape_cast %41 : vector<8xf32> to vector<8x1xf32>
    %43 = tpu.reciprocal %42 : vector<8x1xf32> -> vector<8x1xf32>
    %44 = vector.broadcast %43 : vector<8x1xf32> to vector<8x128xf32>
    %45 = arith.mulf %40, %44 : vector<8x128xf32>
    %46 = arith.select %28, %23, %45 : vector<8x128xi1>, vector<8x128xf32>
    %c0_28 = arith.constant 0 : index
    %c0_29 = arith.constant 0 : index
    %47 = vector.load %arg6[%c0_28, %c0_29] : memref<8x128xf32, #tpu.memory_space<vmem>>, vector<8x128xf32>
    tpu.vector_store %arg6[%c0_28, %c0_29], %46 {strides = array<i32>} : memref<8x128xf32, #tpu.memory_space<vmem>>, vector<8x128xf32>,
    return
  }
  func.func @transform_0(%arg0: i32) -> (i32, i32) {
    %c0_i32 = arith.constant 0 : i32
    %c0_i32_0 = arith.constant 0 : i32
    return %arg0, %c0_i32 : i32, i32
  }
  func.func @transform_1(%arg0: i32) -> (i32, i32) {
    %c0_i32 = arith.constant 0 : i32
    %c0_i32_0 = arith.constant 0 : i32
    %c0_i32_1 = arith.constant 0 : i32
    return %c0_i32, %c0_i32_0 : i32, i32
  }
  func.func @transform_2(%arg0: i32) -> (i32, i32) {
    %c0_i32 = arith.constant 0 : i32
    %c0_i32_0 = arith.constant 0 : i32
    %c0_i32_1 = arith.constant 0 : i32
    return %c0_i32, %c0_i32_0 : i32, i32
  }
  func.func @transform_3(%arg0: i32) -> (i32, i32) {
    %c0_i32 = arith.constant 0 : i32
    %c0_i32_0 = arith.constant 0 : i32
    %c0_i32_1 = arith.constant 0 : i32
    return %c0_i32, %c0_i32_0 : i32, i32
  }
  func.func @transform_4(%arg0: i32) -> (i32, i32) {
    %c0_i32 = arith.constant 0 : i32
    %c0_i32_0 = arith.constant 0 : i32
    %c0_i32_1 = arith.constant 0 : i32
    return %c0_i32, %c0_i32_0 : i32, i32
  }
  func.func @transform_5(%arg0: i32) -> (i32, i32) {
    %c0_i32 = arith.constant 0 : i32
    %c0_i32_0 = arith.constant 0 : i32
    return %arg0, %c0_i32 : i32, i32
  }
}

</mosaic_0001>

<bundles_post_ra>
// kernel: tpu_custom_call.1
= control target key start
LH: loop header
LB: loop body
LE: loop exit
PB: predicated region body
PF: predicated region fallthrough
CT: control target
= control target key end

     0   :  { %10 = vsyncpa [#allocation4], 0  ;;  %s828_s0 = inlined_call_operand.hbm [shape: f32[8,9], index: 0, kind: input, shape index: {}]   ;;  %s829_s1 = inlined_call_operand.hbm [shape: f32[128,128], index: 1, kind: input, shape index: {}]   ;;  %s830_s2 = inlined_call_operand.hbm [shape: f32[128,128], index: 2, kind: input, shape index: {}]   ;;  %s831_s3 = inlined_call_operand.hbm [shape: f32[128,128], index: 3, kind: input, shape index: {}]   ;;  %s832_s4 = inlined_call_operand.hbm [shape: f32[8,128], index: 4, kind: input, shape index: {}]   ;;  %s833_s5 = inlined_call_operand.hbm [shape: f32[8,128], index: 5, kind: output, shape index: {}]  }
   0x1   :  { %11 = vsyncpa [#allocation7], 0 }
   0x2   :  { %12 = vsyncpa [#allocation10], 0 }
   0x3   :  { %13 = vsyncpa [#allocation5], 0  ;;  %s702_s18 = smov [#allocation6]  }
   0x4   :  { %s29_s19 = sshll.u32 %s702_s18, 4  ;;  %s30_s19 = int_to_ptr.vmem [resolvable:$true] %s29_s19 }
   0x5   :  { %s582_s20 = scalar_lea.vmem %s30_s19, 2048  ;;  %p587_p1 = scmp.lt.s32.totalorder %s30_s19, %s30_s19 }
   0x6   :  { %p583_p0 = scmp.ne.s32.totalorder %s30_s19, %s582_s20  ;;  %p588_p2 = scmp.lt.s32.totalorder %s582_s20, %s582_s20 }
   0x8   :  { %p589_p3 = por %p588_p2, %p587_p1 }
   0xa   :  { %p590_p4 = pnand %p589_p3, %p583_p0 }
   0xc   :  { %593 = shalt.err (!%p590_p4)
}
   0xd   :  { %s703_s21 = smov 128   ;;  %s704_s22 = smov 8  }
   0xe   :  { %35 = dma.hbm_to_vmem [thread:$0]  %s829_s1, 2048, %s30_s19, [#allocation7], %s703_s21, %s703_s21, %s704_s22  }
   0xf   :  { %s705_s25 = smov [#allocation9]   ;;  %s706_s27 = smov [#allocation3]  }
  0x10   :  { %s53_s26 = sshll.u32 %s705_s25, 4  ;;  %s20_s28 = sshll.u32 %s706_s27, 4  ;;  %s54_s26 = int_to_ptr.vmem [resolvable:$true] %s53_s26  ;;  %s21_s28 = int_to_ptr.vmem [resolvable:$true] %s20_s28 }
  0x11   :  { %s602_s29 = scalar_lea.vmem %s54_s26, 2048  ;;  %p607_p6 = scmp.lt.s32.totalorder %s54_s26, %s54_s26 }
  0x12   :  { %p603_p5 = scmp.ne.s32.totalorder %s54_s26, %s602_s29  ;;  %p608_p7 = scmp.lt.s32.totalorder %s602_s29, %s602_s29 }
  0x14   :  { %p609_p8 = por %p608_p7, %p607_p6 }
  0x16   :  { %p610_p9 = pnand %p609_p8, %p603_p5 }
  0x18   :  { %613 = shalt.err (!%p610_p9)
}
  0x19   :  { %59 = dma.hbm_to_vmem [thread:$0]  %s831_s3, 2048, %s54_s26, [#allocation10], %s703_s21, %s703_s21, %s704_s22  }
  0x1a   :  { %s622_s1 = scalar_lea.vmem %s21_s28, 128  ;;  %p627_p11 = scmp.lt.s32.totalorder %s21_s28, %s21_s28 }
  0x1b   :  { %p623_p10 = scmp.ne.s32.totalorder %s21_s28, %s622_s1  ;;  %p628_p12 = scmp.lt.s32.totalorder %s622_s1, %s622_s1 }
  0x1d   :  { %p629_p13 = por %p628_p12, %p627_p11 }
  0x1f   :  { %p630_p0 = pnand %p629_p13, %p623_p10 }
  0x21   :  { %633 = shalt.err (!%p630_p0)
}
  0x22   :  { %23 = dma.hbm_to_vmem [thread:$0]  %s828_s0, 128, %s21_s28, [#allocation4]  }
  0x23   :  { %s707_s9 = smov [#allocation8]   ;;  %s708_s11 = smov [#allocation11]  }
  0x24   :  { %s41_s10 = sshll.u32 %s707_s9, 4  ;;  %s66_s12 = sshll.u32 %s708_s11, 4  ;;  %s42_s10 = int_to_ptr.vmem [resolvable:$true] %s41_s10  ;;  %s67_s12 = int_to_ptr.vmem [resolvable:$true] %s66_s12 }
  0x25   :  { %s642_s13 = scalar_lea.vmem %s42_s10, 2048  ;;  %p647_p2 = scmp.lt.s32.totalorder %s42_s10, %s42_s10 }
  0x26   :  { %p643_p1 = scmp.ne.s32.totalorder %s42_s10, %s642_s13  ;;  %p648_p3 = scmp.lt.s32.totalorder %s642_s13, %s642_s13 }
  0x28   :  { %p649_p4 = por %p648_p3, %p647_p2 }
  0x2a   :  { %p650_p5 = pnand %p649_p4, %p643_p1 }
  0x2c   :  { %653 = shalt.err (!%p650_p5)
}
  0x2d   :  { %47 = dma.hbm_to_vmem [thread:$0]  %s830_s2, 2048, %s42_s10, [#allocation7], %s703_s21, %s703_s21, %s704_s22  }
  0x2e   :  { %s662_s0 = scalar_lea.vmem %s67_s12, 128  ;;  %p667_p7 = scmp.lt.s32.totalorder %s67_s12, %s67_s12 }
  0x2f   :  { %p663_p6 = scmp.ne.s32.totalorder %s67_s12, %s662_s0  ;;  %p668_p8 = scmp.lt.s32.totalorder %s662_s0, %s662_s0 }
  0x31   :  { %p669_p9 = por %p668_p8, %p667_p7 }
  0x33   :  { %p670_p10 = pnand %p669_p9, %p663_p6 }
  0x35   :  { %673 = shalt.err (!%p670_p10)
}
  0x36   :  { %69 = dma.hbm_to_vmem [thread:$0]  %s832_s4, 128, %s67_s12, [#allocation10]  }
  0x37   :  { %694 = dma.done.wait [#allocation4], 128  }
  0x38   :  { %695 = vsyncadd [#allocation4], 4294967168 }
  0x39   :  { %696 = dma.done.wait [#allocation7], 4096  }
  0x3a   :  { %697 = vsyncadd [#allocation7], 4294963200 }
  0x3b   :  { %698 = dma.done.wait [#allocation10], 2176  }
  0x3c   :  { %699 = vsyncadd [#allocation10], 4294965120  ;;  %v709_v0 = vmov 0.0   ;;  %vm710_vm0 = vmmov 0   ;;  %v105_v1 = vld [vmem:[#allocation6 + $0x78] sm:$0xff]  ;;  %v104_v2 = vld [vmem:[#allocation6 + $0x70] sm:$0xff]  ;;  %v365_v61 = vlaneseq }
  0x3d   :  { %455 = vmatprep.subr.mxu0 %v709_v0  ;;  %85 = vst [vmem:[#allocation2] sm:$0xff] %v709_v0  ;;  %487 = vmatprep.mubr.msk.f32.mxu0 %vm710_vm0, %v709_v0  ;;  %v103_v3 = vld [vmem:[#allocation6 + $0x68] sm:$0xff]  ;;  %vm87_vm1 = vcmask 72704   ;;  %v102_v4 = vld [vmem:[#allocation6 + $0x60] sm:$0xff]  ;;  %v86_v5 = vld [vmem:[#allocation3] sm:$0xff]  ;;  %s711_s2 = smov [#allocation12]  }
  0x3e   :  { %490 = vmatprep.subr.mxu1 %v709_v0  ;;  %522 = vmatprep.mubr.msk.f32.mxu1 %vm710_vm0, %v709_v0  ;;  %v197_v6 = vld [vmem:[#allocation8 + $0x78] sm:$0xff]  ;;  %88 = vst.msk [vmem:[#allocation2] sm:$0xff] %vm87_vm1, %v86_v5  ;;  %v196_v8 = vld [vmem:[#allocation8 + $0x70] sm:$0xff]  ;;  %v195_v9 = vld [vmem:[#allocation8 + $0x68] sm:$0xff]  ;;  %v366_v62 = vand.u32 127, %v365_v61  ;;  %s390_s4 = sshll.u32 %s711_s2, 4  ;;  %s391_s4 = int_to_ptr.vmem [resolvable:$true] %s390_s4 }
  0x3f   :  { %456 = vmatpush3.msra.mxu0 %v105_v1  ;;  %v101_v7 = vld [vmem:[#allocation6 + $0x58] sm:$0xff]  ;;  %491 = vmatpush3.msra.mxu1 %v197_v6  ;;  %v100_v10 = vld [vmem:[#allocation6 + $0x50] sm:$0xff]  ;;  %v194_v11 = vld [vmem:[#allocation8 + $0x60] sm:$0xff]  ;;  %s674_s17 = scalar_lea.vmem %s391_s4, 128  ;;  %p679_p12 = scmp.lt.s32.totalorder %s391_s4, %s391_s4 }
  0x40   :  { %457 = vmatprep.subr.mxu0 %v709_v0  ;;  %492 = vmatprep.subr.mxu1 %v709_v0  ;;  %v99_v12 = vld [vmem:[#allocation6 + $0x48] sm:$0xff]  ;;  %v193_v13 = vld [vmem:[#allocation8 + $0x58] sm:$0xff]  ;;  %v98_v14 = vld [vmem:[#allocation6 + $0x40] sm:$0xff]  ;;  %vm367_vm2 = vcmp.lt.s32.totalorder %v366_v62, 8  ;;  %vm368_vm3 = vcmp.eq.s32.totalorder %v366_v62, 8  ;;  %p675_p11 = scmp.ne.s32.totalorder %s391_s4, %s674_s17  ;;  %p680_p13 = scmp.lt.s32.totalorder %s674_s17, %s674_s17 }
  0x41   :  { %458 = vmatpush3.msra.mxu0 %v104_v2  ;;  %493 = vmatpush3.msra.mxu1 %v196_v8  ;;  %v192_v15 = vld [vmem:[#allocation8 + $0x50] sm:$0xff]  ;;  %v97_v16 = vld [vmem:[#allocation6 + $0x38] sm:$0xff]  ;;  %v191_v17 = vld [vmem:[#allocation8 + $0x48] sm:$0xff] }
  0x42   :  { %459 = vmatprep.subr.mxu0 %v709_v0  ;;  %494 = vmatprep.subr.mxu1 %v709_v0  ;;  %v96_v18 = vld [vmem:[#allocation6 + $0x30] sm:$0xff]  ;;  %v190_v19 = vld [vmem:[#allocation8 + $0x40] sm:$0xff]  ;;  %v95_v20 = vld [vmem:[#allocation6 + $0x28] sm:$0xff]  ;;  %p681_p0 = por %p680_p13, %p679_p12 }
  0x43   :  { %460 = vmatpush3.msra.mxu0 %v103_v3  ;;  %495 = vmatpush3.msra.mxu1 %v195_v9  ;;  %v189_v21 = vld [vmem:[#allocation8 + $0x38] sm:$0xff]  ;;  %v94_v22 = vld [vmem:[#allocation6 + $0x20] sm:$0xff]  ;;  %v188_v23 = vld [vmem:[#allocation8 + $0x30] sm:$0xff] }
  0x44   :  { %461 = vmatprep.subr.mxu0 %v709_v0  ;;  %496 = vmatprep.subr.mxu1 %v709_v0  ;;  %v93_v24 = vld [vmem:[#allocation6 + $0x18] sm:$0xff]  ;;  %v187_v25 = vld [vmem:[#allocation8 + $0x28] sm:$0xff]  ;;  %v92_v26 = vld [vmem:[#allocation6 + $0x10] sm:$0xff]  ;;  %p682_p1 = pnand %p681_p0, %p675_p11 }
  0x45   :  { %462 = vmatpush3.msra.mxu0 %v102_v4  ;;  %497 = vmatpush3.msra.mxu1 %v194_v11  ;;  %v186_v27 = vld [vmem:[#allocation8 + $0x20] sm:$0xff]  ;;  %v91_v28 = vld [vmem:[#allocation6 + $0x8] sm:$0xff]  ;;  %v185_v29 = vld [vmem:[#allocation8 + $0x18] sm:$0xff] }
  0x46   :  { %463 = vmatprep.subr.mxu0 %v709_v0  ;;  %498 = vmatprep.subr.mxu1 %v709_v0  ;;  %v90_v30 = vld [vmem:[#allocation6] sm:$0xff]  ;;  %v798_v31 = vld [vmem:[#allocation2] sm:$0xff]  ;;  %v183_v33 = vld [vmem:[#allocation8 + $0x8] sm:$0xff] }
  0x47   :  { %464 = vmatpush3.msra.mxu0 %v101_v7  ;;  %499 = vmatpush3.msra.mxu1 %v193_v13  ;;  %v184_v32 = vld [vmem:[#allocation8 + $0x10] sm:$0xff]  ;;  %v182_v34 = vld [vmem:[#allocation8] sm:$0xff]  ;;  %v289_v35 = vld [vmem:[#allocation9 + $0x78] sm:$0xff]  ;;  %v369_v63 = vsel %vm367_vm2, %v798_v31, 0.0 }
  0x48   :  { %465 = vmatprep.subr.mxu0 %v709_v0  ;;  %500 = vmatprep.subr.mxu1 %v709_v0  ;;  %v288_v36 = vld [vmem:[#allocation9 + $0x70] sm:$0xff]  ;;  %v287_v37 = vld [vmem:[#allocation9 + $0x68] sm:$0xff]  ;;  %v286_v38 = vld [vmem:[#allocation9 + $0x60] sm:$0xff]  ;;  %v370_v2 = vmul.f32 1e+10, %v369_v63 }
  0x49   :  { %466 = vmatpush3.msra.mxu0 %v100_v10  ;;  %501 = vmatpush3.msra.mxu1 %v192_v15  ;;  %v285_v39 = vld [vmem:[#allocation9 + $0x58] sm:$0xff]  ;;  %v284_v40 = vld [vmem:[#allocation9 + $0x50] sm:$0xff]  ;;  %v283_v41 = vld [vmem:[#allocation9 + $0x48] sm:$0xff] }
  0x4a   :  { %467 = vmatprep.subr.mxu0 %v709_v0  ;;  %502 = vmatprep.subr.mxu1 %v709_v0  ;;  %v282_v42 = vld [vmem:[#allocation9 + $0x40] sm:$0xff]  ;;  %v281_v43 = vld [vmem:[#allocation9 + $0x38] sm:$0xff]  ;;  %v280_v44 = vld [vmem:[#allocation9 + $0x30] sm:$0xff] }
  0x4b   :  { %468 = vmatpush3.msra.mxu0 %v99_v12  ;;  %503 = vmatpush3.msra.mxu1 %v191_v17  ;;  %v279_v45 = vld [vmem:[#allocation9 + $0x28] sm:$0xff]  ;;  %v278_v46 = vld [vmem:[#allocation9 + $0x20] sm:$0xff]  ;;  %v277_v47 = vld [vmem:[#allocation9 + $0x18] sm:$0xff] }
  0x4c   :  { %469 = vmatprep.subr.mxu0 %v709_v0  ;;  %504 = vmatprep.subr.mxu1 %v709_v0  ;;  %v401_v48 = vld [vmem:[#allocation11] ss:$0 sm:$0xff]  ;;  %v276_v53 = vld [vmem:[#allocation9 + $0x10] sm:$0xff]  ;;  %v275_v54 = vld [vmem:[#allocation9 + $0x8] sm:$0xff] }
  0x4d   :  { %470 = vmatpush3.msra.mxu0 %v98_v14  ;;  %505 = vmatpush3.msra.mxu1 %v190_v19  ;;  %v274_v55 = vld [vmem:[#allocation9] sm:$0xff] }
  0x4e   :  { %471 = vmatprep.subr.mxu0 %v709_v0  ;;  %506 = vmatprep.subr.mxu1 %v709_v0  ;;  %v402_v56 = vld [vmem:[#allocation11 + $0x1] ss:$0 sm:$0xff]  ;;  %v403_v1 = vld [vmem:[#allocation11 + $0x2] ss:$0 sm:$0xff] }
  0x4f   :  { %472 = vmatpush3.msra.mxu0 %v97_v16  ;;  %507 = vmatpush3.msra.mxu1 %v189_v21 }
  0x50   :  { %473 = vmatprep.subr.mxu0 %v709_v0  ;;  %508 = vmatprep.subr.mxu1 %v709_v0 }
  0x51   :  { %474 = vmatpush3.msra.mxu0 %v96_v18  ;;  %509 = vmatpush3.msra.mxu1 %v188_v23 }
  0x52   :  { %475 = vmatprep.subr.mxu0 %v709_v0  ;;  %510 = vmatprep.subr.mxu1 %v709_v0 }
  0x53   :  { %476 = vmatpush3.msra.mxu0 %v95_v20  ;;  %511 = vmatpush3.msra.mxu1 %v187_v25 }
  0x54   :  { %477 = vmatprep.subr.mxu0 %v709_v0  ;;  %512 = vmatprep.subr.mxu1 %v709_v0 }
  0x55   :  { %478 = vmatpush3.msra.mxu0 %v94_v22  ;;  %513 = vmatpush3.msra.mxu1 %v186_v27 }
  0x56   :  { %479 = vmatprep.subr.mxu0 %v709_v0  ;;  %514 = vmatprep.subr.mxu1 %v709_v0 }
  0x57   :  { %480 = vmatpush3.msra.mxu0 %v93_v24  ;;  %515 = vmatpush3.msra.mxu1 %v185_v29 }
  0x58   :  { %481 = vmatprep.subr.mxu0 %v709_v0  ;;  %516 = vmatprep.subr.mxu1 %v709_v0 }
  0x59   :  { %482 = vmatpush3.msra.mxu0 %v92_v26  ;;  %517 = vmatpush3.msra.mxu1 %v184_v32 }
  0x5a   :  { %483 = vmatprep.subr.mxu0 %v709_v0  ;;  %518 = vmatprep.subr.mxu1 %v709_v0 }
  0x5b   :  { %484 = vmatpush3.msra.mxu0 %v91_v28  ;;  %519 = vmatpush3.msra.mxu1 %v183_v33 }
  0x5c   :  { %485 = vmatprep.subr.mxu0 %v709_v0  ;;  %520 = vmatprep.subr.mxu1 %v709_v0 }
  0x5d   :  { %486 = vmatpush3.msra.mxu0 %v90_v30  ;;  %521 = vmatpush3.msra.mxu1 %v182_v34 }
  0x5e   :  { %488 = vmatmul.mubr.f32.vlgmr.msra.gmra.mxu0 %v798_v31  ;;  %525 = vmatprep.subr.mxu0 %v709_v0 }
  0x5f   :  { %557 = vmatprep.mubr.msk.f32.mxu0 %vm710_vm0, %v709_v0  ;;  %526 = vmatpush3.msra.mxu0 %v289_v35 }
  0x60   :  { %527 = vmatprep.subr.mxu0 %v709_v0 }
  0x61   :  { %528 = vmatpush3.msra.mxu0 %v288_v36 }
  0x62   :  { %529 = vmatprep.subr.mxu0 %v709_v0 }
  0x63   :  { %530 = vmatpush3.msra.mxu0 %v287_v37 }
  0x64   :  { %531 = vmatprep.subr.mxu0 %v709_v0 }
  0x65   :  { %532 = vmatpush3.msra.mxu0 %v286_v38 }
  0x66   :  { %533 = vmatprep.subr.mxu0 %v709_v0 }
  0x67   :  { %534 = vmatpush3.msra.mxu0 %v285_v39 }
  0x68   :  { %535 = vmatprep.subr.mxu0 %v709_v0 }
  0x69   :  { %536 = vmatpush3.msra.mxu0 %v284_v40 }
  0x6a   :  { %537 = vmatprep.subr.mxu0 %v709_v0 }
  0x6b   :  { %538 = vmatpush3.msra.mxu0 %v283_v41 }
  0x6c   :  { %539 = vmatprep.subr.mxu0 %v709_v0 }
  0x6d   :  { %540 = vmatpush3.msra.mxu0 %v282_v42 }
  0x6e   :  { %541 = vmatprep.subr.mxu0 %v709_v0 }
  0x6f   :  { %542 = vmatpush3.msra.mxu0 %v281_v43 }
  0x70   :  { %543 = vmatprep.subr.mxu0 %v709_v0 }
  0x71   :  { %544 = vmatpush3.msra.mxu0 %v280_v44 }
  0x72   :  { %545 = vmatprep.subr.mxu0 %v709_v0 }
  0x73   :  { %546 = vmatpush3.msra.mxu0 %v279_v45 }
  0x74   :  { %547 = vmatprep.subr.mxu0 %v709_v0 }
  0x75   :  { %548 = vmatpush3.msra.mxu0 %v278_v46 }
  0x76   :  { %549 = vmatprep.subr.mxu0 %v709_v0 }
  0x77   :  { %550 = vmatpush3.msra.mxu0 %v277_v47 }
  0x78   :  { %551 = vmatprep.subr.mxu0 %v709_v0 }
  0x79   :  { %552 = vmatpush3.msra.mxu0 %v276_v53 }
  0x7a   :  { %553 = vmatprep.subr.mxu0 %v709_v0 }
  0x7b   :  { %554 = vmatpush3.msra.mxu0 %v275_v54 }
  0x7c   :  { %555 = vmatprep.subr.mxu0 %v709_v0 }
  0x7d   :  { %556 = vmatpush3.msra.mxu0 %v274_v55 }
 0x11e   :  { %v177_v49 = vpop.f32.mrf.mxu0 }
 0x11f   :  { %v178_v50 = vadd.f32 %v401_v48, %v177_v49 }
 0x120   :  { %v489_v51 = vpop.f32.mrf.mxu0 }
 0x121   :  { %v181_v52 = vmax.f32 %v178_v50, 0.0 }
 0x123   :  { %523 = vmatmul.mubr.f32.vlgmr.msra.gmra.mxu1 %v181_v52 }
 0x1e3   :  { %v269_v57 = vpop.f32.mrf.mxu1 }
 0x1e4   :  { %v270_v58 = vadd.f32 %v402_v56, %v269_v57 }
 0x1e5   :  { %v524_v59 = vpop.f32.mrf.mxu1 }
 0x1e6   :  { %v273_v60 = vmax.f32 %v270_v58, 0.0 }
 0x1e8   :  { %558 = vmatmul.mubr.f32.vlgmr.msra.gmra.mxu0 %v273_v60 }
 0x2a8   :  { %v361_v3 = vpop.f32.mrf.mxu0 }
 0x2a9   :  { %v362_v4 = vadd.f32 %v403_v1, %v361_v3 }
 0x2aa   :  { %v559_v5 = vpop.f32.mrf.mxu0 }
 0x2ab   :  { %v371_v6 = vsub.f32 %v362_v4, %v370_v2 }
 0x2ad   :  { %v372_v0 = vsel %vm367_vm2, %v371_v6, -inf }
 0x2ae   :  { %373 = vmax.xlane.f32.xlu0 %v372_v0 }
 0x337   :  { %v374_v7 = vpop.xlane.xlu0 %373 }
 0x338   :  { %v375_v8 = vsub.f32 %v372_v0, %v374_v7 }
 0x33a   :  { %v376_v9 = vmul.f32 1.442695, %v375_v8 }
 0x33c   :  { %570 = vpow2.f32 %v376_v9 }
 0x349   :  { %v571_v10 = vpop.eup %570 }
 0x34a   :  { %378 = vadd.xlane.f32.xlu0 %v571_v10 }
 0x3d3   :  { %v379_v11 = vpop.xlane.xlu0 %378 }
 0x3d4   :  { %572 = vrcp.f32 %v379_v11 }
 0x3e1   :  { %v573_v12 = vpop.eup %572 }
 0x3e2   :  { %v381_v13 = vmul.f32 %v573_v12, %v571_v10 }
 0x3e4   :  { %v382_v14 = vsel %vm368_vm3, %v362_v4, %v381_v13 }
 0x3e5   :  { %383 = vst [vmem:[#allocation12] sm:$0xff] %v382_v14 }
 0x3e6   :  { %685 = shalt.err (!%p682_p1)
}
 0x3e7   :  { %393 = dma.vmem_to_hbm [thread:$0]  %s391_s4, 128, %s833_s5, [#allocation5]  }
 0x3e8   :  { %700 = dma.done.wait [#allocation5], 128  }
 0x3e9   :  { %701 = vsyncadd [#allocation5], 4294967168 }
 0x3ea   :  { %397 = vsyncpa [#allocation4], 1 }
 0x3eb   :  { %398 = vsyncpa [#allocation7], 1 }
 0x3ec   :  { %399 = vsyncpa [#allocation10], 1 }
 0x3ed   :  { %400 = vsyncpa [#allocation5], 1 }

</bundles_post_ra>
